<compile_context>
chip_gen: v5e
topology: v5e:2x2
jax: 0.10.0
libtpu: 0.0.40
codegen_flags: <defaults>
</compile_context>

<pallas_src>
import functools

import jax
import jax.numpy as jnp
from jax import lax
from jax.experimental import pallas as pl
from jax.experimental.pallas import tpu as pltpu


def _round_up(n, m):
    return ((n + m - 1) // m) * m


def _pick_row_tile(n_rows):
    """Row (parallel) tile: largest of 512/256/128 dividing n_rows while still
    leaving >= 2 row programs (so the parallel axis can split across the two
    v7x TensorCores)."""
    for t in (512, 256, 128):
        if n_rows % t == 0 and n_rows // t >= 2:
            return t
    return n_rows  # n_rows == 128: a single tile


def _pick_k_tile(n_rows):
    """Reduction (arbitrary) tile: largest of 512/256/128 dividing n_rows.
    512x512 bf16 A tiles (~0.5 MiB, double-buffered ~1 MiB) comfortably fit
    the default scoped VMEM on v5e/v6e/v7x."""
    for t in (512, 256, 128):
        if n_rows % t == 0:
            return t
    return 128


# ----------------------------------------------------------------------------
# Kernel 1: h_scaled = D^-1/2 * relu( (D^-1/2 A D^-1/2 x) @ W1 + b1 )
#   acc += A_bin[i,k] @ xs[k]            (bf16 MXU, f32 accumulate, xs resident)
#   last k: row-scale by d_inv_sqrt, bf16 dense layer, ReLU (f32), pre-scale
#   for the next layer's column scaling, store bf16.
# ----------------------------------------------------------------------------
def _layer1_kernel(a_ref, xs_ref, dinv_ref, w1_ref, b1_ref, hs_ref, acc_ref,
                   *, tk, nk):
    k = pl.program_id(1)            # hoisted: never call program_id inside pl.when

    @pl.when(k == 0)
    def _init():
        acc_ref[...] = jnp.zeros_like(acc_ref)

    xs_blk = xs_ref[pl.ds(k * tk, tk), :]        # slice the resident operand
    acc_ref[...] += jnp.dot(a_ref[...], xs_blk,
                            preferred_element_type=jnp.float32)

    @pl.when(k == nk - 1)
    def _finalize():
        dinv = dinv_ref[...]                                    # (tm, 1) f32
        agg = (acc_ref[...] * dinv).astype(jnp.bfloat16)        # row scaling
        h = jnp.dot(agg, w1_ref[...],
                    preferred_element_type=jnp.float32) + b1_ref[...]
        h = jnp.maximum(h, 0.0)
        # pre-apply the column scaling needed by the second A @ (.) pass
        hs_ref[...] = (h * dinv).astype(hs_ref.dtype)


# ----------------------------------------------------------------------------
# Kernel 2: fused node head + graph head.
#   acc += A_aug[i,k] @ hs[k]    -- row `graph_row` of A_aug is the mean-pool
#                                   row, so acc[graph_row] == mean(h) for free.
#   last k: node = (dinv*acc) @ W2 + b2 for the whole tile; the graph head is
#   computed only in the tile that owns graph_row, and only for that row.
# ----------------------------------------------------------------------------
def _layer2_kernel(a_ref, hs_ref, dinv_ref, w2_ref, b2_ref, wg_ref, bg_ref,
                   out_ref, acc_ref, *, tk, nk, graph_tile, graph_local_row):
    i = pl.program_id(0)            # hoisted out of the pl.when bodies
    k = pl.program_id(1)

    @pl.when(k == 0)
    def _init():
        acc_ref[...] = jnp.zeros_like(acc_ref)

    hs_blk = hs_ref[pl.ds(k * tk, tk), :]
    acc_ref[...] += jnp.dot(a_ref[...], hs_blk,
                            preferred_element_type=jnp.float32)

    @pl.when(k == nk - 1)
    def _finalize():
        agg = (acc_ref[...] * dinv_ref[...]).astype(jnp.bfloat16)   # (tm, H)
        node = jnp.dot(agg, w2_ref[...],
                       preferred_element_type=jnp.float32) + b2_ref[...]
        out_ref[...] = node.astype(out_ref.dtype)

        # Graph head: only the one row tile containing the virtual pooling row
        # pays for it, and only a (1, H) x (H, C) matmul.
        @pl.when(i == graph_tile)
        def _graph_head():
            g_in = agg[graph_local_row:graph_local_row + 1, :]
            graph = jnp.dot(g_in, wg_ref[...],
                            preferred_element_type=jnp.float32) + bg_ref[...]
            out_ref[graph_local_row:graph_local_row + 1, :] = graph.astype(
                out_ref.dtype)


# ----------------------------------------------------------------------------
# Full forward (jitted): bf16 adjacency build (glue) + two tiled grid sweeps.
# ----------------------------------------------------------------------------
def _explainable_gnn_forward(x, edge_index, params):
    n, f = x.shape
    f_pad = params["w1"].shape[0]
    h_pad = params["w1"].shape[1]
    c_pad = params["w2"].shape[1]

    # Row count: real nodes + 1 virtual pooling row, padded only to the 128
    # tile grain (padding N^2 work to 512 multiples wasted up to ~3x HBM/MXU).
    n_rows = _round_up(n + 1, 128)
    graph_row = n

    tm = _pick_row_tile(n_rows)
    tk = _pick_k_tile(n_rows)
    graph_tile = graph_row // tm
    graph_local_row = graph_row % tm

    # --- dense binary adjacency + self loops, built directly in bf16 ---------
    # NOTE: duplicate edges collapse (set, not add) and an explicit self-loop
    # edge ends up with A[i,i] = 2 after the +I; A is not symmetrized (assumes
    # both directions are present if the graph is undirected). 0/1/2 entries
    # are exact in bf16.
    src, dst = edge_index[0], edge_index[1]
    a = jnp.zeros((n_rows, n_rows), jnp.bfloat16)
    a = a.at[src, dst].set(1.0)
    diag = jnp.arange(n)
    a = a.at[diag, diag].add(1.0)

    deg = jnp.sum(a, axis=1, dtype=jnp.float32)      # exact counts in f32
    safe_deg = jnp.where(deg > 0, deg, 1.0)
    d_inv_sqrt = jnp.where(deg > 0, lax.rsqrt(safe_deg), 0.0)

    # Virtual pooling row: (1/N) * sqrt(deg_j) undoes the column scaling baked
    # into h_scaled, so (A_aug @ h_scaled)[graph_row] == mean(h).
    row_ids = jnp.arange(n_rows)
    pool_row = jnp.where(row_ids < n, jnp.sqrt(safe_deg) / n, 0.0)
    a = a.at[graph_row, :].set(pool_row.astype(jnp.bfloat16))
    d_inv_sqrt = d_inv_sqrt.at[graph_row].set(1.0)

    dinv = d_inv_sqrt.reshape(n_rows, 1)             # f32 (n_rows, 1)

    # Pre-scale + lane-pad x to 128 features (column scaling of the norm).
    xs = jnp.zeros((n_rows, f_pad), jnp.float32).at[:n, :f].set(x)
    xs = (xs * dinv).astype(jnp.bfloat16)

    grid = (n_rows // tm, n_rows // tk)
    nk = grid[1]
    cparams = pltpu.CompilerParams(
        dimension_semantics=("parallel", "arbitrary"))

    # --- sweep 1: layer-1 aggregation + MLP -> h_scaled (bf16) ---------------
    hs = pl.pallas_call(
        functools.partial(_layer1_kernel, tk=tk, nk=nk),
        out_shape=jax.ShapeDtypeStruct((n_rows, h_pad), jnp.bfloat16),
        grid_spec=pltpu.PrefetchScalarGridSpec(
            num_scalar_prefetch=0,
            grid=grid,
            in_specs=[
                pl.BlockSpec((tm, tk), lambda i, k: (i, k)),         # A tile
                pl.BlockSpec((n_rows, f_pad), lambda i, k: (0, 0)),  # xs resident
                pl.BlockSpec((tm, 1), lambda i, k: (i, 0)),          # d_inv_sqrt rows
                pl.BlockSpec((f_pad, h_pad), lambda i, k: (0, 0)),   # W1 (bf16)
                pl.BlockSpec((1, h_pad), lambda i, k: (0, 0)),       # b1 (f32)
            ],
            out_specs=pl.BlockSpec((tm, h_pad), lambda i, k: (i, 0)),
            scratch_shapes=[pltpu.VMEM((tm, f_pad), jnp.float32)],   # lane-dense acc
        ),
        compiler_params=cparams,
    )(a, xs, dinv, params["w1"], params["b1"])

    # --- sweep 2: layer-2 aggregation + fused node/graph heads ---------------
    fused = pl.pallas_call(
        functools.partial(_layer2_kernel, tk=tk, nk=nk,
                          graph_tile=graph_tile,
                          graph_local_row=graph_local_row),
        out_shape=jax.ShapeDtypeStruct((n_rows, c_pad), jnp.float32),
        grid_spec=pltpu.PrefetchScalarGridSpec(
            num_scalar_prefetch=0,
            grid=grid,
            in_specs=[
                pl.BlockSpec((tm, tk), lambda i, k: (i, k)),          # A_aug tile
                pl.BlockSpec((n_rows, h_pad), lambda i, k: (0, 0)),   # hs resident
                pl.BlockSpec((tm, 1), lambda i, k: (i, 0)),           # d_inv_sqrt rows
                pl.BlockSpec((h_pad, c_pad), lambda i, k: (0, 0)),    # W2 (bf16)
                pl.BlockSpec((1, c_pad), lambda i, k: (0, 0)),        # b2 (f32)
                pl.BlockSpec((h_pad, c_pad), lambda i, k: (0, 0)),    # Wg (bf16)
                pl.BlockSpec((1, c_pad), lambda i, k: (0, 0)),        # bg (f32)
            ],
            out_specs=pl.BlockSpec((tm, c_pad), lambda i, k: (i, 0)),
            scratch_shapes=[pltpu.VMEM((tm, h_pad), jnp.float32)],
        ),
        compiler_params=cparams,
    )(a, hs, dinv, params["w2"], params["b2"], params["wg"], params["bg"])

    return fused


_forward_jit = jax.jit(_explainable_gnn_forward)


class SyntheticGNNModel:
    """Inner `model`: Data(x, edge_index) -> dict of outputs."""

    def __init__(self, in_features, hidden, out_features, key):
        k1, k2, k3 = jax.random.split(key, 3)
        f_pad = _round_up(in_features, 128)
        h_pad = _round_up(hidden, 128)
        c_pad = _round_up(out_features, 128)
        w1 = (jax.random.normal(k1, (in_features, hidden), jnp.float32)
              / jnp.sqrt(float(in_features)))
        w2 = (jax.random.normal(k2, (hidden, out_features), jnp.float32)
              / jnp.sqrt(float(hidden)))
        wg = (jax.random.normal(k3, (hidden, out_features), jnp.float32)
              / jnp.sqrt(float(hidden)))
        # Weights: zero-padded to lane-friendly shapes once at init and stored
        # bf16 (native MXU operand dtype). Biases stay f32 for the VPU adds.
        self.params = {
            "w1": jnp.zeros((f_pad, h_pad), jnp.float32)
                     .at[:in_features, :hidden].set(w1).astype(jnp.bfloat16),
            "b1": jnp.zeros((1, h_pad), jnp.float32),
            "w2": jnp.zeros((h_pad, c_pad), jnp.float32)
                     .at[:hidden, :out_features].set(w2).astype(jnp.bfloat16),
            "b2": jnp.zeros((1, c_pad), jnp.float32),
            "wg": jnp.zeros((h_pad, c_pad), jnp.float32)
                     .at[:hidden, :out_features].set(wg).astype(jnp.bfloat16),
            "bg": jnp.zeros((1, c_pad), jnp.float32),
        }
        self.out_features = out_features

    def __call__(self, data):
        x, edge_index = data["x"], data["edge_index"]
        n = x.shape[0]
        c = self.out_features
        fused = _forward_jit(x, edge_index, self.params)
        # fused is the [node_out; graph_out] slab produced by the kernels.
        return {"node_out": fused[:n, :c], "graph_out": fused[n:n + 1, :c]}


class ExplainableModel:
    """JAX/Pallas port of Source/explainers/utils.py::ExplainableModel."""

    def __init__(self, model, targets=None):
        self.model = model
        self.targets = targets

    def __call__(self, *data, **kwargs):
        if len(data) == 1 and isinstance(data[0], dict):
            data = data[0]
        elif len(data) == 2:
            x, edge_index = data
            data = {"x": x, "edge_index": edge_index}
        elif "data" in kwargs:
            data = kwargs["data"]
        elif "x" in kwargs and "edge_index" in kwargs:
            data = {"x": kwargs["x"], "edge_index": kwargs["edge_index"]}
        else:
            raise ValueError(f"invalid format of data: {data}")
        result = self.model(data)
        if self.targets is None:
            output = list(result.values())
        else:
            output = [result[target] for target in self.targets]
        # torch.cat(output, dim=0)  (slices of one fused kernel output)
        return jnp.concatenate(output, axis=0)


# Pure-JAX reference (same padded bf16 weights, f32 activations) for a loose
# numerical sanity check of the kernel path.
def _pure_jax_reference(x, edge_index, params):
    n, f = x.shape
    w1 = params["w1"].astype(jnp.float32)
    w2 = params["w2"].astype(jnp.float32)
    wg = params["wg"].astype(jnp.float32)
    a = jnp.zeros((n, n), jnp.float32).at[edge_index[0], edge_index[1]].set(1.0)
    a = a.at[jnp.arange(n), jnp.arange(n)].add(1.0)
    deg = a.sum(1)
    dis = jnp.where(deg > 0, 1.0 / jnp.sqrt(jnp.where(deg > 0, deg, 1.0)), 0.0)
    an = dis[:, None] * a * dis[None, :]
    xp = jnp.zeros((n, w1.shape[0]), jnp.float32).at[:, :f].set(x)
    h = jnp.maximum(an @ xp @ w1 + params["b1"], 0.0)
    node = an @ h @ w2 + params["b2"]
    graph = jnp.mean(h, axis=0, keepdims=True) @ wg + params["bg"]
    return node, graph


# TODO(synk): for genuinely sparse graphs at large N, replace the dense O(N^2)
# adjacency with a scalar-prefetched CSR gather (PrefetchScalarGridSpec +
# manual make_async_copy double buffering) instead of densifying.
# TODO(synk): on v7x only, the binary part of A could be stored fp8 (exact for
# 0/1/2) to halve the dominant HBM stream, keeping the pool row bf16.

if __name__ == "__main__":
    key = jax.random.PRNGKey(0)
    k_x, k_e, k_m = jax.random.split(key, 3)

    N, F, H, C, E = 16, 32, 32, 8, 48
    x = jax.random.normal(k_x, (N, F), jnp.float32)
    edge_index = jax.random.randint(k_e, (2, E), 0, N, dtype=jnp.int32)

    inner = SyntheticGNNModel(in_features=F, hidden=H, out_features=C, key=k_m)
    model = ExplainableModel(inner, targets=None)

    out = jax.block_until_ready(model(x, edge_index))       # [N, C] ++ [1, C]
    assert out.shape == (N + 1, C), out.shape
    assert bool(jnp.all(jnp.isfinite(out)))

    out2 = jax.block_until_ready(model(x=x, edge_index=edge_index))
    assert out2.shape == (N + 1, C)

    out3 = jax.block_until_ready(
        ExplainableModel(inner, targets=["graph_out", "node_out"])(
            {"x": x, "edge_index": edge_index}))
    assert out3.shape == (N + 1, C)

    # Loose-tolerance numerical check (bf16 operands in the kernel path).
    node_ref, graph_ref = _pure_jax_reference(x, edge_index, inner.params)
    ok_node = bool(jnp.allclose(out[:N], node_ref[:, :C], atol=1e-1, rtol=1e-1))
    ok_graph = bool(jnp.allclose(out[N:N + 1], graph_ref[:, :C],
                                 atol=1e-1, rtol=1e-1))
    if not (ok_node and ok_graph):
        raise AssertionError("kernel output mismatch vs pure-JAX reference")

    print("KERNEL_OK")
</pallas_src>

<mosaic_0001>
module attributes {stable_mosaic.version = 11 : i64} {
  func.func @_layer1_kernel(%arg0: i32, %arg1: i32, %arg2: memref<128x128xbf16, #tpu.memory_space<vmem>>, %arg3: memref<128x128xbf16, #tpu.memory_space<vmem>>, %arg4: memref<128x1xf32, #tpu.memory_space<vmem>>, %arg5: memref<128x128xbf16, #tpu.memory_space<vmem>>, %arg6: memref<1x128xf32, #tpu.memory_space<vmem>>, %arg7: memref<128x128xbf16, #tpu.memory_space<vmem>>, %arg8: memref<128x128xf32, #tpu.memory_space<vmem>>) attributes {dimension_semantics = [#tpu.dimension_semantics<parallel>, #tpu.dimension_semantics<arbitrary>], iteration_bounds = array<i64: 1, 1>, scalar_prefetch = 0 : i64, scratch_operands = 1 : i64, tpu.core_type = #tpu.core_type<tc>, window_params = [{transform_indices = @transform_0, window_bounds = array<i64: 128, 128>}, {pipeline_mode = #tpu.pipeline_mode<synchronous>, transform_indices = @transform_1, window_bounds = array<i64: 128, 128>}, {transform_indices = @transform_2, window_bounds = array<i64: 128, 1>}, {pipeline_mode = #tpu.pipeline_mode<synchronous>, transform_indices = @transform_3, window_bounds = array<i64: 128, 128>}, {pipeline_mode = #tpu.pipeline_mode<synchronous>, transform_indices = @transform_4, window_bounds = array<i64: 1, 128>}, {transform_indices = @transform_5, window_bounds = array<i64: 128, 128>}]} {
    %c0_i32 = arith.constant 0 : i32
    %0 = arith.cmpi eq, %arg1, %c0_i32 : i32
    %1 = arith.extui %0 : i1 to i32
    %c0_i32_0 = arith.constant 0 : i32
    %2 = arith.cmpi ne, %1, %c0_i32_0 : i32
    scf.if %2 {
      %cst_9 = arith.constant 0.000000e+00 : f32
      %14 = vector.broadcast %cst_9 : f32 to vector<128x128xf32>
      %c0_10 = arith.constant 0 : index
      %c0_11 = arith.constant 0 : index
      %15 = vector.load %arg8[%c0_10, %c0_11] : memref<128x128xf32, #tpu.memory_space<vmem>>, vector<128x128xf32>
      tpu.vector_store %arg8[%c0_10, %c0_11], %14 {strides = array<i32>} : memref<128x128xf32, #tpu.memory_space<vmem>>, vector<128x128xf32>,
    } else {
    }
    %c128_i32 = arith.constant 128 : i32
    %3 = arith.muli %arg1, %c128_i32 : i32
    %4 = arith.index_cast %3 : i32 to index
    %c0 = arith.constant 0 : index
    %5 = vector.load %arg3[%4, %c0] : memref<128x128xbf16, #tpu.memory_space<vmem>>, vector<128x128xbf16>
    %c0_1 = arith.constant 0 : index
    %c0_2 = arith.constant 0 : index
    %6 = vector.load %arg8[%c0_1, %c0_2] : memref<128x128xf32, #tpu.memory_space<vmem>>, vector<128x128xf32>
    %c0_3 = arith.constant 0 : index
    %c0_4 = arith.constant 0 : index
    %7 = vector.load %arg2[%c0_3, %c0_4] : memref<128x128xbf16, #tpu.memory_space<vmem>>, vector<128x128xbf16>
    %cst = arith.constant dense<0.000000e+00> : vector<128x128xf32>
    %8 = tpu.matmul %7, %5, %cst {dimension_numbers = #tpu.dot_dimension_numbers<[1], [0], [0], [1], [0, 0, 1, 1], [], []>} : vector<128x128xbf16>, vector<128x128xbf16>, vector<128x128xf32> -> vector<128x128xf32>
    %9 = arith.addf %6, %8 : vector<128x128xf32>
    %c0_5 = arith.constant 0 : index
    %c0_6 = arith.constant 0 : index
    %10 = vector.load %arg8[%c0_5, %c0_6] : memref<128x128xf32, #tpu.memory_space<vmem>>, vector<128x128xf32>
    tpu.vector_store %arg8[%c0_5, %c0_6], %9 {strides = array<i32>} : memref<128x128xf32, #tpu.memory_space<vmem>>, vector<128x128xf32>,
    %c0_i32_7 = arith.constant 0 : i32
    %11 = arith.cmpi eq, %arg1, %c0_i32_7 : i32
    %12 = arith.extui %11 : i1 to i32
    %c0_i32_8 = arith.constant 0 : i32
    %13 = arith.cmpi ne, %12, %c0_i32_8 : i32
    scf.if %13 {
      %c0_9 = arith.constant 0 : index
      %c0_10 = arith.constant 0 : index
      %14 = vector.load %arg4[%c0_9, %c0_10] : memref<128x1xf32, #tpu.memory_space<vmem>>, vector<128x1xf32>
      %c0_11 = arith.constant 0 : index
      %c0_12 = arith.constant 0 : index
      %15 = vector.load %arg8[%c0_11, %c0_12] : memref<128x128xf32, #tpu.memory_space<vmem>>, vector<128x128xf32>
      %16 = vector.broadcast %14 : vector<128x1xf32> to vector<128x128xf32>
      %17 = arith.mulf %15, %16 : vector<128x128xf32>
      %18 = arith.truncf %17 : vector<128x128xf32> to vector<128x128xbf16>
      %c0_13 = arith.constant 0 : index
      %c0_14 = arith.constant 0 : index
      %19 = vector.load %arg5[%c0_13, %c0_14] : memref<128x128xbf16, #tpu.memory_space<vmem>>, vector<128x128xbf16>
      %cst_15 = arith.constant dense<0.000000e+00> : vector<128x128xf32>
      %20 = tpu.matmul %18, %19, %cst_15 {dimension_numbers = #tpu.dot_dimension_numbers<[1], [0], [0], [1], [0, 0, 1, 1], [], []>} : vector<128x128xbf16>, vector<128x128xbf16>, vector<128x128xf32> -> vector<128x128xf32>
      %c0_16 = arith.constant 0 : index
      %c0_17 = arith.constant 0 : index
      %21 = vector.load %arg6[%c0_16, %c0_17] : memref<1x128xf32, #tpu.memory_space<vmem>>, vector<1x128xf32>
      %22 = vector.broadcast %21 : vector<1x128xf32> to vector<128x128xf32>
      %23 = arith.addf %20, %22 : vector<128x128xf32>
      %cst_18 = arith.constant 0.000000e+00 : f32
      %24 = vector.broadcast %cst_18 : f32 to vector<128x128xf32>
      %25 = arith.maximumf %23, %24 : vector<128x128xf32>
      %26 = vector.broadcast %14 : vector<128x1xf32> to vector<128x128xf32>
      %27 = arith.mulf %25, %26 : vector<128x128xf32>
      %28 = arith.truncf %27 : vector<128x128xf32> to vector<128x128xbf16>
      %c0_19 = arith.constant 0 : index
      %c0_20 = arith.constant 0 : index
      %29 = vector.load %arg7[%c0_19, %c0_20] : memref<128x128xbf16, #tpu.memory_space<vmem>>, vector<128x128xbf16>
      tpu.vector_store %arg7[%c0_19, %c0_20], %28 {strides = array<i32>} : memref<128x128xbf16, #tpu.memory_space<vmem>>, vector<128x128xbf16>,
    } else {
    }
    return
  }
  func.func @transform_0(%arg0: i32, %arg1: i32) -> (i32, i32) {
    %c0_i32 = arith.constant 0 : i32
    return %arg0, %arg1 : i32, i32
  }
  func.func @transform_1(%arg0: i32, %arg1: i32) -> (i32, i32) {
    %c0_i32 = arith.constant 0 : i32
    %c0_i32_0 = arith.constant 0 : i32
    %c0_i32_1 = arith.constant 0 : i32
    return %c0_i32, %c0_i32_0 : i32, i32
  }
  func.func @transform_2(%arg0: i32, %arg1: i32) -> (i32, i32) {
    %c0_i32 = arith.constant 0 : i32
    %c0_i32_0 = arith.constant 0 : i32
    return %arg0, %c0_i32 : i32, i32
  }
  func.func @transform_3(%arg0: i32, %arg1: i32) -> (i32, i32) {
    %c0_i32 = arith.constant 0 : i32
    %c0_i32_0 = arith.constant 0 : i32
    %c0_i32_1 = arith.constant 0 : i32
    return %c0_i32, %c0_i32_0 : i32, i32
  }
  func.func @transform_4(%arg0: i32, %arg1: i32) -> (i32, i32) {
    %c0_i32 = arith.constant 0 : i32
    %c0_i32_0 = arith.constant 0 : i32
    %c0_i32_1 = arith.constant 0 : i32
    return %c0_i32, %c0_i32_0 : i32, i32
  }
  func.func @transform_5(%arg0: i32, %arg1: i32) -> (i32, i32) {
    %c0_i32 = arith.constant 0 : i32
    %c0_i32_0 = arith.constant 0 : i32
    return %arg0, %c0_i32 : i32, i32
  }
}

module attributes {stable_mosaic.version = 11 : i64} {
  func.func @_layer2_kernel(%arg0: i32, %arg1: i32, %arg2: memref<128x128xbf16, #tpu.memory_space<vmem>>, %arg3: memref<128x128xbf16, #tpu.memory_space<vmem>>, %arg4: memref<128x1xf32, #tpu.memory_space<vmem>>, %arg5: memref<128x128xbf16, #tpu.memory_space<vmem>>, %arg6: memref<1x128xf32, #tpu.memory_space<vmem>>, %arg7: memref<128x128xbf16, #tpu.memory_space<vmem>>, %arg8: memref<1x128xf32, #tpu.memory_space<vmem>>, %arg9: memref<128x128xf32, #tpu.memory_space<vmem>>, %arg10: memref<128x128xf32, #tpu.memory_space<vmem>>) attributes {dimension_semantics = [#tpu.dimension_semantics<parallel>, #tpu.dimension_semantics<arbitrary>], iteration_bounds = array<i64: 1, 1>, scalar_prefetch = 0 : i64, scratch_operands = 1 : i64, tpu.core_type = #tpu.core_type<tc>, window_params = [{transform_indices = @transform_0, window_bounds = array<i64: 128, 128>}, {pipeline_mode = #tpu.pipeline_mode<synchronous>, transform_indices = @transform_1, window_bounds = array<i64: 128, 128>}, {transform_indices = @transform_2, window_bounds = array<i64: 128, 1>}, {pipeline_mode = #tpu.pipeline_mode<synchronous>, transform_indices = @transform_3, window_bounds = array<i64: 128, 128>}, {pipeline_mode = #tpu.pipeline_mode<synchronous>, transform_indices = @transform_4, window_bounds = array<i64: 1, 128>}, {pipeline_mode = #tpu.pipeline_mode<synchronous>, transform_indices = @transform_5, window_bounds = array<i64: 128, 128>}, {pipeline_mode = #tpu.pipeline_mode<synchronous>, transform_indices = @transform_6, window_bounds = array<i64: 1, 128>}, {transform_indices = @transform_7, window_bounds = array<i64: 128, 128>}]} {
    %c0_i32 = arith.constant 0 : i32
    %0 = arith.cmpi eq, %arg1, %c0_i32 : i32
    %1 = arith.extui %0 : i1 to i32
    %c0_i32_0 = arith.constant 0 : i32
    %2 = arith.cmpi ne, %1, %c0_i32_0 : i32
    scf.if %2 {
      %cst_9 = arith.constant 0.000000e+00 : f32
      %14 = vector.broadcast %cst_9 : f32 to vector<128x128xf32>
      %c0_10 = arith.constant 0 : index
      %c0_11 = arith.constant 0 : index
      %15 = vector.load %arg10[%c0_10, %c0_11] : memref<128x128xf32, #tpu.memory_space<vmem>>, vector<128x128xf32>
      tpu.vector_store %arg10[%c0_10, %c0_11], %14 {strides = array<i32>} : memref<128x128xf32, #tpu.memory_space<vmem>>, vector<128x128xf32>,
    } else {
    }
    %c128_i32 = arith.constant 128 : i32
    %3 = arith.muli %arg1, %c128_i32 : i32
    %4 = arith.index_cast %3 : i32 to index
    %c0 = arith.constant 0 : index
    %5 = vector.load %arg3[%4, %c0] : memref<128x128xbf16, #tpu.memory_space<vmem>>, vector<128x128xbf16>
    %c0_1 = arith.constant 0 : index
    %c0_2 = arith.constant 0 : index
    %6 = vector.load %arg10[%c0_1, %c0_2] : memref<128x128xf32, #tpu.memory_space<vmem>>, vector<128x128xf32>
    %c0_3 = arith.constant 0 : index
    %c0_4 = arith.constant 0 : index
    %7 = vector.load %arg2[%c0_3, %c0_4] : memref<128x128xbf16, #tpu.memory_space<vmem>>, vector<128x128xbf16>
    %cst = arith.constant dense<0.000000e+00> : vector<128x128xf32>
    %8 = tpu.matmul %7, %5, %cst {dimension_numbers = #tpu.dot_dimension_numbers<[1], [0], [0], [1], [0, 0, 1, 1], [], []>} : vector<128x128xbf16>, vector<128x128xbf16>, vector<128x128xf32> -> vector<128x128xf32>
    %9 = arith.addf %6, %8 : vector<128x128xf32>
    %c0_5 = arith.constant 0 : index
    %c0_6 = arith.constant 0 : index
    %10 = vector.load %arg10[%c0_5, %c0_6] : memref<128x128xf32, #tpu.memory_space<vmem>>, vector<128x128xf32>
    tpu.vector_store %arg10[%c0_5, %c0_6], %9 {strides = array<i32>} : memref<128x128xf32, #tpu.memory_space<vmem>>, vector<128x128xf32>,
    %c0_i32_7 = arith.constant 0 : i32
    %11 = arith.cmpi eq, %arg1, %c0_i32_7 : i32
    %12 = arith.extui %11 : i1 to i32
    %c0_i32_8 = arith.constant 0 : i32
    %13 = arith.cmpi ne, %12, %c0_i32_8 : i32
    scf.if %13 {
      %c0_9 = arith.constant 0 : index
      %c0_10 = arith.constant 0 : index
      %14 = vector.load %arg10[%c0_9, %c0_10] : memref<128x128xf32, #tpu.memory_space<vmem>>, vector<128x128xf32>
      %c0_11 = arith.constant 0 : index
      %c0_12 = arith.constant 0 : index
      %15 = vector.load %arg4[%c0_11, %c0_12] : memref<128x1xf32, #tpu.memory_space<vmem>>, vector<128x1xf32>
      %16 = vector.broadcast %15 : vector<128x1xf32> to vector<128x128xf32>
      %17 = arith.mulf %14, %16 : vector<128x128xf32>
      %18 = arith.truncf %17 : vector<128x128xf32> to vector<128x128xbf16>
      %c0_13 = arith.constant 0 : index
      %c0_14 = arith.constant 0 : index
      %19 = vector.load %arg5[%c0_13, %c0_14] : memref<128x128xbf16, #tpu.memory_space<vmem>>, vector<128x128xbf16>
      %cst_15 = arith.constant dense<0.000000e+00> : vector<128x128xf32>
      %20 = tpu.matmul %18, %19, %cst_15 {dimension_numbers = #tpu.dot_dimension_numbers<[1], [0], [0], [1], [0, 0, 1, 1], [], []>} : vector<128x128xbf16>, vector<128x128xbf16>, vector<128x128xf32> -> vector<128x128xf32>
      %c0_16 = arith.constant 0 : index
      %c0_17 = arith.constant 0 : index
      %21 = vector.load %arg6[%c0_16, %c0_17] : memref<1x128xf32, #tpu.memory_space<vmem>>, vector<1x128xf32>
      %22 = vector.broadcast %21 : vector<1x128xf32> to vector<128x128xf32>
      %23 = arith.addf %20, %22 : vector<128x128xf32>
      %c0_18 = arith.constant 0 : index
      %c0_19 = arith.constant 0 : index
      %24 = vector.load %arg9[%c0_18, %c0_19] : memref<128x128xf32, #tpu.memory_space<vmem>>, vector<128x128xf32>
      tpu.vector_store %arg9[%c0_18, %c0_19], %23 {strides = array<i32>} : memref<128x128xf32, #tpu.memory_space<vmem>>, vector<128x128xf32>,
      %c0_i32_20 = arith.constant 0 : i32
      %25 = arith.cmpi eq, %arg0, %c0_i32_20 : i32
      %26 = arith.extui %25 : i1 to i32
      %c0_i32_21 = arith.constant 0 : i32
      %27 = arith.cmpi ne, %26, %c0_i32_21 : i32
      scf.if %27 {
        %28 = vector.extract_strided_slice %18 {offsets = [16, 0], sizes = [1, 128], strides = [1, 1]} : vector<128x128xbf16> to vector<1x128xbf16>
        %c0_22 = arith.constant 0 : index
        %c0_23 = arith.constant 0 : index
        %29 = vector.load %arg7[%c0_22, %c0_23] : memref<128x128xbf16, #tpu.memory_space<vmem>>, vector<128x128xbf16>
        %cst_24 = arith.constant dense<0.000000e+00> : vector<1x128xf32>
        %30 = tpu.matmul %28, %29, %cst_24 {dimension_numbers = #tpu.dot_dimension_numbers<[1], [0], [0], [1], [0, 0, 1, 1], [], []>} : vector<1x128xbf16>, vector<128x128xbf16>, vector<1x128xf32> -> vector<1x128xf32>
        %c0_25 = arith.constant 0 : index
        %c0_26 = arith.constant 0 : index
        %31 = vector.load %arg8[%c0_25, %c0_26] : memref<1x128xf32, #tpu.memory_space<vmem>>, vector<1x128xf32>
        %32 = arith.addf %30, %31 : vector<1x128xf32>
        %c16 = arith.constant 16 : index
        %c0_27 = arith.constant 0 : index
        %33 = vector.load %arg9[%c16, %c0_27] : memref<128x128xf32, #tpu.memory_space<vmem>>, vector<1x128xf32>
        tpu.vector_store %arg9[%c16, %c0_27], %32 {strides = array<i32>} : memref<128x128xf32, #tpu.memory_space<vmem>>, vector<1x128xf32>,
      } else {
      }
    } else {
    }
    return
  }
  func.func @transform_0(%arg0: i32, %arg1: i32) -> (i32, i32) {
    %c0_i32 = arith.constant 0 : i32
    return %arg0, %arg1 : i32, i32
  }
  func.func @transform_1(%arg0: i32, %arg1: i32) -> (i32, i32) {
    %c0_i32 = arith.constant 0 : i32
    %c0_i32_0 = arith.constant 0 : i32
    %c0_i32_1 = arith.constant 0 : i32
    return %c0_i32, %c0_i32_0 : i32, i32
  }
  func.func @transform_2(%arg0: i32, %arg1: i32) -> (i32, i32) {
    %c0_i32 = arith.constant 0 : i32
    %c0_i32_0 = arith.constant 0 : i32
    return %arg0, %c0_i32 : i32, i32
  }
  func.func @transform_3(%arg0: i32, %arg1: i32) -> (i32, i32) {
    %c0_i32 = arith.constant 0 : i32
    %c0_i32_0 = arith.constant 0 : i32
    %c0_i32_1 = arith.constant 0 : i32
    return %c0_i32, %c0_i32_0 : i32, i32
  }
  func.func @transform_4(%arg0: i32, %arg1: i32) -> (i32, i32) {
    %c0_i32 = arith.constant 0 : i32
    %c0_i32_0 = arith.constant 0 : i32
    %c0_i32_1 = arith.constant 0 : i32
    return %c0_i32, %c0_i32_0 : i32, i32
  }
  func.func @transform_5(%arg0: i32, %arg1: i32) -> (i32, i32) {
    %c0_i32 = arith.constant 0 : i32
    %c0_i32_0 = arith.constant 0 : i32
    %c0_i32_1 = arith.constant 0 : i32
    return %c0_i32, %c0_i32_0 : i32, i32
  }
  func.func @transform_6(%arg0: i32, %arg1: i32) -> (i32, i32) {
    %c0_i32 = arith.constant 0 : i32
    %c0_i32_0 = arith.constant 0 : i32
    %c0_i32_1 = arith.constant 0 : i32
    return %c0_i32, %c0_i32_0 : i32, i32
  }
  func.func @transform_7(%arg0: i32, %arg1: i32) -> (i32, i32) {
    %c0_i32 = arith.constant 0 : i32
    %c0_i32_0 = arith.constant 0 : i32
    return %arg0, %c0_i32 : i32, i32
  }
}

</mosaic_0001>

<bundles_post_ra>
// kernel: _explainable_gnn_forward.2
= control target key start
LH: loop header
LB: loop body
LE: loop exit
PB: predicated region body
PF: predicated region fallthrough
CT: control target
= control target key end

     0   :  { %v784_v1 = vmov 0   ;;  %s1044_s1 = inlined_call_operand.vmem [shape: bf16[128,128], index: 1, kind: input, shape index: {}]   ;;  %s1045_s2 = inlined_call_operand.vmem [shape: f32[128,1], index: 2, kind: input, shape index: {}]   ;;  %s1046_s0 = inlined_call_operand.vmem [shape: bf16[128,128], index: 0, kind: input, shape index: {}]   ;;  %s1047_s3 = inlined_call_operand.vmem [shape: bf16[128,128], index: 3, kind: input, shape index: {}]   ;;  %s1048_s4 = inlined_call_operand.vmem [shape: f32[1,128], index: 4, kind: input, shape index: {}]   ;;  %s1049_s5 = inlined_call_operand.vmem [shape: bf16[128,128], index: 5, kind: output, shape index: {}]  }
   0x1   :  { %v699_v0 = vld [vmem:[%s1044_s1 + $0x38] sm:$0xff]  ;;  %780 = vset.pattern.permute.xlu0 %v784_v1  ;;  %v281_v2 = vld [vmem:[%s1045_s2 + $0x40] sm:$0xff]  ;;  %781 = vset.pattern.permute.xlu1 %v784_v1  ;;  %v698_v3 = vld [vmem:[%s1044_s1 + $0x30] sm:$0xff] }
   0x2   :  { %347 = vperm.xlu0 %780, %v281_v2   ;;  %782 = vset.pattern.permute.xlu2 %v784_v1  ;;  %v273_v4 = vld [vmem:[%s1045_s2] sm:$0xff]  ;;  %v697_v5 = vld [vmem:[%s1044_s1 + $0x28] sm:$0xff]  ;;  %v695_v9 = vld [vmem:[%s1044_s1 + $0x18] sm:$0xff] }
   0x3   :  { %189 = vmatpush.bf16.msra.mxu0 %v699_v0  ;;  %763 = vmatpush.bf16.msra.mxu2 %v699_v0  ;;  %v282_v6 = vld [vmem:[%s1045_s2 + $0x48] sm:$0xff]  ;;  %v696_v8 = vld [vmem:[%s1044_s1 + $0x20] sm:$0xff]  ;;  %v275_v10 = vld [vmem:[%s1045_s2 + $0x10] sm:$0xff] }
   0x4   :  { %307 = vperm.xlu1 %781, %v273_v4   ;;  %v274_v7 = vld [vmem:[%s1045_s2 + $0x8] sm:$0xff]  ;;  %v276_v11 = vld [vmem:[%s1045_s2 + $0x18] sm:$0xff]  ;;  %v283_v12 = vld [vmem:[%s1045_s2 + $0x50] sm:$0xff] }
   0x5   :  { %v694_v13 = vld [vmem:[%s1044_s1 + $0x10] sm:$0xff]  ;;  %357 = vperm.xlu2 %782, %v283_v12   ;;  %v693_v14 = vld [vmem:[%s1044_s1 + $0x8] sm:$0xff]  ;;  %v277_v16 = vld [vmem:[%s1045_s2 + $0x20] sm:$0xff] }
   0x6   :  { %v286_v15 = vld [vmem:[%s1045_s2 + $0x68] sm:$0xff]  ;;  %v692_v17 = vld [vmem:[%s1044_s1] sm:$0xff]  ;;  %v287_v20 = vld [vmem:[%s1045_s2 + $0x70] sm:$0xff] }
   0x7   :  { %190 = vmatpush.bf16.msra.mxu0 %v698_v3  ;;  %764 = vmatpush.bf16.msra.mxu2 %v698_v3  ;;  %v700_v18 = vld [vmem:[%s1046_s0] sm:$0xff]  ;;  %v288_v21 = vld [vmem:[%s1045_s2 + $0x78] sm:$0xff]  ;;  %v701_v25 = vld [vmem:[%s1046_s0 + $0x8] sm:$0xff] }
   0x8   :  { %v704_v19 = vld [vmem:[%s1046_s0 + $0x20] sm:$0xff]  ;;  %v284_v22 = vld [vmem:[%s1045_s2 + $0x58] sm:$0xff]  ;;  %v705_v26 = vld [vmem:[%s1046_s0 + $0x28] sm:$0xff] }
   0x9   :  { %v280_v23 = vld [vmem:[%s1045_s2 + $0x38] sm:$0xff]  ;;  %v285_v24 = vld [vmem:[%s1045_s2 + $0x60] sm:$0xff]  ;;  %v278_v27 = vld [vmem:[%s1045_s2 + $0x28] sm:$0xff] }
   0xa   :  { %352 = vperm.xlu0 %780, %v282_v6   ;;  %v279_v28 = vld [vmem:[%s1045_s2 + $0x30] sm:$0xff]  ;;  %v703_v31 = vld [vmem:[%s1046_s0 + $0x18] sm:$0xff]  ;;  %v713_v35 = vld [vmem:[%s1047_s3 + $0x28] sm:$0xff] }
   0xb   :  { %191 = vmatpush.bf16.msra.mxu0 %v697_v5  ;;  %765 = vmatpush.bf16.msra.mxu2 %v697_v5  ;;  %v702_v29 = vld [vmem:[%s1046_s0 + $0x10] sm:$0xff]  ;;  %v707_v32 = vld [vmem:[%s1046_s0 + $0x38] sm:$0xff]  ;;  %v712_v36 = vld [vmem:[%s1047_s3 + $0x20] sm:$0xff] }
   0xc   :  { %312 = vperm.xlu1 %781, %v274_v7   ;;  %v706_v30 = vld [vmem:[%s1046_s0 + $0x30] sm:$0xff]  ;;  %v715_v33 = vld [vmem:[%s1047_s3 + $0x38] sm:$0xff]  ;;  %v709_v39 = vld [vmem:[%s1047_s3 + $0x8] sm:$0xff] }
   0xd   :  { %362 = vperm.xlu2 %782, %v284_v22   ;;  %477 = vmatpush.bf16.msra.mxu1 %v715_v33  ;;  %v714_v34 = vld [vmem:[%s1047_s3 + $0x30] sm:$0xff]  ;;  %v711_v37 = vld [vmem:[%s1047_s3 + $0x18] sm:$0xff]  ;;  %v708_v40 = vld [vmem:[%s1047_s3] sm:$0xff] }
   0xe   :  { %771 = vmatpush.bf16.msra.mxu3 %v715_v33  ;;  %v710_v38 = vld [vmem:[%s1047_s3 + $0x10] sm:$0xff] }
   0xf   :  { %192 = vmatpush.bf16.msra.mxu0 %v696_v8  ;;  %766 = vmatpush.bf16.msra.mxu2 %v696_v8 }
  0x11   :  { %478 = vmatpush.bf16.msra.mxu1 %v714_v34 }
  0x12   :  { %317 = vperm.xlu0 %780, %v275_v10   ;;  %772 = vmatpush.bf16.msra.mxu3 %v714_v34  ;;  %v986_v34 = vld [vmem:[%s1048_s4] ss:$0 sm:$0xff] }
  0x13   :  { %193 = vmatpush.bf16.msra.mxu0 %v695_v9  ;;  %767 = vmatpush.bf16.msra.mxu2 %v695_v9 }
  0x14   :  { %322 = vperm.xlu1 %781, %v276_v11  }
  0x15   :  { %367 = vperm.xlu2 %782, %v285_v24   ;;  %479 = vmatpush.bf16.msra.mxu1 %v713_v35 }
  0x16   :  { %773 = vmatpush.bf16.msra.mxu3 %v713_v35 }
  0x17   :  { %194 = vmatpush.bf16.msra.mxu0 %v694_v13  ;;  %768 = vmatpush.bf16.msra.mxu2 %v694_v13 }
  0x19   :  { %480 = vmatpush.bf16.msra.mxu1 %v712_v36 }
  0x1a   :  { %372 = vperm.xlu0 %780, %v286_v15   ;;  %774 = vmatpush.bf16.msra.mxu3 %v712_v36 }
  0x1b   :  { %195 = vmatpush.bf16.msra.mxu0 %v693_v14  ;;  %769 = vmatpush.bf16.msra.mxu2 %v693_v14 }
  0x1c   :  { %327 = vperm.xlu1 %781, %v277_v16  }
  0x1d   :  { %332 = vperm.xlu2 %782, %v278_v27   ;;  %481 = vmatpush.bf16.msra.mxu1 %v711_v37 }
  0x1e   :  { %775 = vmatpush.bf16.msra.mxu3 %v711_v37 }
  0x1f   :  { %196 = vmatpush.bf16.msra.mxu0 %v692_v17  ;;  %770 = vmatpush.bf16.msra.mxu2 %v692_v17 }
  0x21   :  { %482 = vmatpush.bf16.msra.mxu1 %v710_v38 }
  0x22   :  { %197 = vmatmul.bf16.vlgmr.msra.gmra.mxu0 %v700_v18  ;;  %217 = vmatmul.bf16.vlgmr.msra.gmra.mxu2 %v704_v19 }
  0x23   :  { %377 = vperm.xlu0 %780, %v287_v20   ;;  %776 = vmatpush.bf16.msra.mxu3 %v710_v38 }
  0x24   :  { %382 = vperm.xlu1 %781, %v288_v21  }
  0x25   :  { %337 = vperm.xlu2 %782, %v279_v28   ;;  %483 = vmatpush.bf16.msra.mxu1 %v709_v39 }
  0x27   :  { %777 = vmatpush.bf16.msra.mxu3 %v709_v39 }
  0x29   :  { %484 = vmatpush.bf16.msra.mxu1 %v708_v40 }
  0x2b   :  { %342 = vperm.xlu0 %780, %v280_v23   ;;  %778 = vmatpush.bf16.msra.mxu3 %v708_v40 }
  0x32   :  { %202 = vmatmul.bf16.gmra.mxu0 %v701_v25  ;;  %222 = vmatmul.bf16.gmra.mxu2 %v705_v26 }
  0x42   :  { %207 = vmatmul.bf16.gmra.mxu0 %v702_v29  ;;  %227 = vmatmul.bf16.gmra.mxu2 %v706_v30 }
  0x52   :  { %212 = vmatmul.bf16.gmra.mxu0 %v703_v31  ;;  %232 = vmatmul.bf16.gmra.mxu2 %v707_v32 }
  0x5f   :  { %v942_v48 = vpop.permute.xlu2 %357 }
  0x67   :  { %v949_v57 = vpop.permute.xlu2 %362 }
  0x6f   :  { %v957_v1 = vpop.permute.xlu2 %367 }
  0x74   :  { %v937_v43 = vpop.permute.xlu0 %347 }
  0x76   :  { %v935_v41 = vpop.permute.xlu1 %307 }
  0x77   :  { %v963_v9 = vpop.permute.xlu2 %332 }
  0x7c   :  { %v945_v51 = vpop.permute.xlu0 %352 }
  0x7e   :  { %v940_v46 = vpop.permute.xlu1 %312 }
  0x7f   :  { %v973_v22 = vpop.permute.xlu2 %337 }
  0x84   :  { %v951_v59 = vpop.permute.xlu0 %317 }
  0x86   :  { %v953_v60 = vpop.permute.xlu1 %322 }
  0x8c   :  { %v961_v7 = vpop.permute.xlu0 %372 }
  0x8e   :  { %v965_v10 = vpop.permute.xlu1 %327 }
  0x95   :  { %v969_v15 = vpop.permute.xlu0 %377 }
  0x96   :  { %v979_v28 = vpop.permute.xlu1 %382 }
  0x9d   :  { %v975_v23 = vpop.permute.xlu0 %342 }
  0x9f   :  { %v198_v42 = vpop.f32.mrf.mxu0 }
  0xa0   :  { %v385_v45 = vmul.f32 %v935_v41, %v198_v42 }
  0xa5   :  { %v218_v44 = vpop.f32.mrf.mxu2 }
  0xa6   :  { %v393_v53 = vmul.f32 %v937_v43, %v218_v44 }
  0xa7   :  { %v200_v47 = vpop.f32.mrf.mxu0 }
  0xa8   :  { %v386_v49 = vmul.f32 %v940_v46, %v200_v47 }
  0xaa   :  { %v401_v50 = vpack.c.bf16 %v386_v49, %v385_v45 }
  0xac   :  { %485 = vmatmul.bf16.vlgmr.msra.gmra.mxu1 %v401_v50 }
  0xad   :  { %v220_v52 = vpop.f32.mrf.mxu2 }
  0xae   :  { %v394_v54 = vmul.f32 %v945_v51, %v220_v52 }
  0xaf   :  { %v203_v55 = vpop.f32.mrf.mxu0 }
  0xb0   :  { %v405_v56 = vpack.c.bf16 %v394_v54, %v393_v53  ;;  %v387_v62 = vmul.f32 %v951_v59, %v203_v55 }
  0xb2   :  { %505 = vmatmul.bf16.vlgmr.msra.gmra.mxu3 %v405_v56 }
  0xb5   :  { %v223_v58 = vpop.f32.mrf.mxu2 }
  0xb6   :  { %v395_v3 = vmul.f32 %v942_v48, %v223_v58 }
  0xb7   :  { %v205_v61 = vpop.f32.mrf.mxu0 }
  0xb8   :  { %v388_v63 = vmul.f32 %v953_v60, %v205_v61 }
  0xba   :  { %v402_v0 = vpack.c.bf16 %v388_v63, %v387_v62 }
  0xbc   :  { %490 = vmatmul.bf16.gmra.mxu1 %v402_v0 }
  0xbd   :  { %v225_v2 = vpop.f32.mrf.mxu2 }
  0xbe   :  { %v396_v4 = vmul.f32 %v949_v57, %v225_v2 }
  0xbf   :  { %v208_v5 = vpop.f32.mrf.mxu0 }
  0xc0   :  { %v406_v6 = vpack.c.bf16 %v396_v4, %v395_v3  ;;  %v389_v12 = vmul.f32 %v965_v10, %v208_v5 }
  0xc2   :  { %510 = vmatmul.bf16.gmra.mxu3 %v406_v6 }
  0xc5   :  { %v228_v8 = vpop.f32.mrf.mxu2 }
  0xc6   :  { %v397_v17 = vmul.f32 %v957_v1, %v228_v8 }
  0xc7   :  { %v210_v11 = vpop.f32.mrf.mxu0 }
  0xc8   :  { %v390_v13 = vmul.f32 %v963_v9, %v210_v11 }
  0xca   :  { %v403_v14 = vpack.c.bf16 %v390_v13, %v389_v12 }
  0xcc   :  { %495 = vmatmul.bf16.gmra.mxu1 %v403_v14 }
  0xcd   :  { %v230_v16 = vpop.f32.mrf.mxu2 }
  0xce   :  { %v398_v18 = vmul.f32 %v961_v7, %v230_v16 }
  0xcf   :  { %v213_v19 = vpop.f32.mrf.mxu0 }
  0xd0   :  { %v407_v20 = vpack.c.bf16 %v398_v18, %v397_v17  ;;  %v391_v25 = vmul.f32 %v973_v22, %v213_v19 }
  0xd2   :  { %515 = vmatmul.bf16.gmra.mxu3 %v407_v20 }
  0xd5   :  { %v233_v21 = vpop.f32.mrf.mxu2 }
  0xd6   :  { %v399_v30 = vmul.f32 %v969_v15, %v233_v21 }
  0xd7   :  { %v215_v24 = vpop.f32.mrf.mxu0 }
  0xd8   :  { %v392_v26 = vmul.f32 %v975_v23, %v215_v24 }
  0xda   :  { %v404_v27 = vpack.c.bf16 %v392_v26, %v391_v25 }
  0xdc   :  { %500 = vmatmul.bf16.gmra.mxu1 %v404_v27 }
  0xdd   :  { %v235_v29 = vpop.f32.mrf.mxu2 }
  0xde   :  { %v400_v31 = vmul.f32 %v979_v28, %v235_v29 }
  0xe0   :  { %v408_v32 = vpack.c.bf16 %v400_v31, %v399_v30 }
  0xe2   :  { %520 = vmatmul.bf16.gmra.mxu3 %v408_v32 }
 0x129   :  { %v486_v33 = vpop.f32.mrf.mxu1 }
 0x12a   :  { %v487_v35 = vadd.f32 %v986_v34, %v486_v33 }
 0x12c   :  { %v526_v37 = vmax.f32 %v487_v35, 0.0 }
 0x12e   :  { %v542_v42 = vmul.f32 %v526_v37, %v935_v41 }
 0x131   :  { %v488_v36 = vpop.f32.mrf.mxu1 }
 0x132   :  { %v489_v38 = vadd.f32 %v986_v34, %v488_v36 }
 0x134   :  { %v527_v39 = vmax.f32 %v489_v38, 0.0 }
 0x135   :  { %v506_v40 = vpop.f32.mrf.mxu3 }
 0x136   :  { %v543_v44 = vmul.f32 %v527_v39, %v940_v46  ;;  %v507_v49 = vadd.f32 %v986_v34, %v506_v40 }
 0x138   :  { %v719_v45 = vpack.c.bf16 %v543_v44, %v542_v42  ;;  %v534_v52 = vmax.f32 %v507_v49, 0.0 }
 0x139   :  { %v491_v47 = vpop.f32.mrf.mxu1 }
 0x13a   :  { %720 = vst [vmem:[%s1049_s5] sm:$0xff] %v719_v45   ;;  %v492_v53 = vadd.f32 %v986_v34, %v491_v47  ;;  %v550_v41 = vmul.f32 %v534_v52, %v937_v43 }
 0x13c   :  { %v528_v58 = vmax.f32 %v492_v53, 0.0 }
 0x13d   :  { %v508_v50 = vpop.f32.mrf.mxu3 }
 0x13e   :  { %v509_v54 = vadd.f32 %v986_v34, %v508_v50  ;;  %v544_v2 = vmul.f32 %v528_v58, %v951_v59 }
 0x140   :  { %v535_v55 = vmax.f32 %v509_v54, 0.0 }
 0x141   :  { %v493_v56 = vpop.f32.mrf.mxu1 }
 0x142   :  { %v551_v46 = vmul.f32 %v535_v55, %v945_v51  ;;  %v494_v61 = vadd.f32 %v986_v34, %v493_v56 }
 0x144   :  { %v739_v62 = vpack.c.bf16 %v551_v46, %v550_v41  ;;  %v529_v63 = vmax.f32 %v494_v61, 0.0 }
 0x145   :  { %v511_v0 = vpop.f32.mrf.mxu3 }
 0x146   :  { %759 = vst [vmem:[%s1049_s5 + $0x20] sm:$0xff] %v739_v62   ;;  %v545_v3 = vmul.f32 %v529_v63, %v953_v60  ;;  %v512_v43 = vadd.f32 %v986_v34, %v511_v0 }
 0x148   :  { %v724_v4 = vpack.c.bf16 %v545_v3, %v544_v2  ;;  %v536_v6 = vmax.f32 %v512_v43, 0.0 }
 0x149   :  { %v496_v5 = vpop.f32.mrf.mxu1 }
 0x14a   :  { %756 = vst [vmem:[%s1049_s5 + $0x8] sm:$0xff] %v724_v4   ;;  %v497_v8 = vadd.f32 %v986_v34, %v496_v5  ;;  %v552_v13 = vmul.f32 %v536_v6, %v942_v48 }
 0x14c   :  { %v530_v14 = vmax.f32 %v497_v8, 0.0 }
 0x14d   :  { %v513_v51 = vpop.f32.mrf.mxu3 }
 0x14e   :  { %v514_v59 = vadd.f32 %v986_v34, %v513_v51  ;;  %v546_v20 = vmul.f32 %v530_v14, %v965_v10 }
 0x150   :  { %v537_v11 = vmax.f32 %v514_v59, 0.0 }
 0x151   :  { %v498_v12 = vpop.f32.mrf.mxu1 }
 0x152   :  { %v553_v60 = vmul.f32 %v537_v11, %v949_v57  ;;  %v499_v16 = vadd.f32 %v986_v34, %v498_v12 }
 0x154   :  { %v744_v17 = vpack.c.bf16 %v553_v60, %v552_v13  ;;  %v531_v18 = vmax.f32 %v499_v16, 0.0 }
 0x155   :  { %v516_v19 = vpop.f32.mrf.mxu3 }
 0x156   :  { %760 = vst [vmem:[%s1049_s5 + $0x28] sm:$0xff] %v744_v17   ;;  %v547_v21 = vmul.f32 %v531_v18, %v963_v9  ;;  %v517_v48 = vadd.f32 %v986_v34, %v516_v19 }
 0x158   :  { %v729_v24 = vpack.c.bf16 %v547_v21, %v546_v20  ;;  %v538_v26 = vmax.f32 %v517_v48, 0.0 }
 0x159   :  { %v501_v25 = vpop.f32.mrf.mxu1 }
 0x15a   :  { %757 = vst [vmem:[%s1049_s5 + $0x10] sm:$0xff] %v729_v24   ;;  %v502_v27 = vadd.f32 %v986_v34, %v501_v25  ;;  %v554_v31 = vmul.f32 %v538_v26, %v957_v1 }
 0x15c   :  { %v532_v32 = vmax.f32 %v502_v27, 0.0 }
 0x15d   :  { %v518_v57 = vpop.f32.mrf.mxu3 }
 0x15e   :  { %v519_v10 = vadd.f32 %v986_v34, %v518_v57  ;;  %v548_v38 = vmul.f32 %v532_v32, %v973_v22 }
 0x160   :  { %v539_v29 = vmax.f32 %v519_v10, 0.0 }
 0x161   :  { %v503_v30 = vpop.f32.mrf.mxu1 }
 0x162   :  { %v555_v9 = vmul.f32 %v539_v29, %v961_v7  ;;  %v504_v33 = vadd.f32 %v986_v34, %v503_v30 }
 0x164   :  { %v749_v35 = vpack.c.bf16 %v555_v9, %v554_v31  ;;  %v533_v36 = vmax.f32 %v504_v33, 0.0 }
 0x165   :  { %v521_v37 = vpop.f32.mrf.mxu3 }
 0x166   :  { %761 = vst [vmem:[%s1049_s5 + $0x30] sm:$0xff] %v749_v35   ;;  %v549_v39 = vmul.f32 %v533_v36, %v975_v23  ;;  %v522_v1 = vadd.f32 %v986_v34, %v521_v37 }
 0x168   :  { %v734_v40 = vpack.c.bf16 %v549_v39, %v548_v38  ;;  %v540_v42 = vmax.f32 %v522_v1, 0.0 }
 0x16a   :  { %758 = vst [vmem:[%s1049_s5 + $0x18] sm:$0xff] %v734_v40   ;;  %v556_v22 = vmul.f32 %v540_v42, %v969_v15 }
 0x16d   :  { %v523_v7 = vpop.f32.mrf.mxu3 }
 0x16e   :  { %v524_v44 = vadd.f32 %v986_v34, %v523_v7 }
 0x170   :  { %v541_v45 = vmax.f32 %v524_v44, 0.0 }
 0x172   :  { %v557_v47 = vmul.f32 %v541_v45, %v979_v28 }
 0x174   :  { %v754_v49 = vpack.c.bf16 %v557_v47, %v556_v22 }
 0x176   :  { %762 = vst [vmem:[%s1049_s5 + $0x38] sm:$0xff] %v754_v49  }

// kernel: _explainable_gnn_forward.3
= control target key start
LH: loop header
LB: loop body
LE: loop exit
PB: predicated region body
PF: predicated region fallthrough
CT: control target
= control target key end

     0   :  { %v918_v2 = vmov 0   ;;  %s1119_s0 = inlined_call_operand.vmem [shape: bf16[128,128], index: 0, kind: input, shape index: {}]   ;;  %s1120_s1 = inlined_call_operand.vmem [shape: bf16[128,128], index: 1, kind: input, shape index: {}]   ;;  %s1121_s2 = inlined_call_operand.vmem [shape: f32[128,1], index: 2, kind: input, shape index: {}]   ;;  %s1122_s3 = inlined_call_operand.vmem [shape: bf16[128,128], index: 3, kind: input, shape index: {}]   ;;  %s1123_s4 = inlined_call_operand.vmem [shape: f32[1,128], index: 4, kind: input, shape index: {}]   ;;  %s1124_s5 = inlined_call_operand.vmem [shape: bf16[128,128], index: 5, kind: input, shape index: {}]   ;;  %s1125_s6 = inlined_call_operand.vmem [shape: f32[1,128], index: 6, kind: input, shape index: {}]   ;;  %s1126_s7 = inlined_call_operand.hbm [shape: f32[128,128], index: 7, kind: output, shape index: {}]  }
   0x1   :  { %v843_v0 = vld [vmem:[%s1120_s1 + $0x38] sm:$0xff]  ;;  %v296_v1 = vld [vmem:[%s1121_s2] sm:$0xff]  ;;  %888 = vset.pattern.permute.xlu0 %v918_v2  ;;  %889 = vset.pattern.permute.xlu1 %v918_v2  ;;  %v842_v3 = vld [vmem:[%s1120_s1 + $0x30] sm:$0xff] }
   0x2   :  { %196 = vmatpush.bf16.msra.mxu0 %v843_v0  ;;  %868 = vmatpush.bf16.msra.mxu3 %v843_v0  ;;  %v306_v4 = vld [vmem:[%s1121_s2 + $0x50] sm:$0xff]  ;;  %v841_v5 = vld [vmem:[%s1120_s1 + $0x28] sm:$0xff] }
   0x3   :  { %314 = vperm.xlu0 %888, %v296_v1   ;;  %890 = vset.pattern.permute.xlu2 %v918_v2 }
   0x4   :  { %364 = vperm.xlu1 %889, %v306_v4  }
   0x6   :  { %197 = vmatpush.bf16.msra.mxu0 %v842_v3  ;;  %869 = vmatpush.bf16.msra.mxu3 %v842_v3 }
   0x7   :  { %12 = vsyncpa [#allocation4], 0  ;;  %v297_v6 = vld [vmem:[%s1121_s2 + $0x8] sm:$0xff]  ;;  %v307_v7 = vld [vmem:[%s1121_s2 + $0x58] sm:$0xff]  ;;  %s694_s26 = sshll.u32 %s1126_s7, 4  ;;  %s921_s27 = smov 8   ;;  %s695_s26 = int_to_ptr.hbm [resolvable:$true] %s694_s26 }
   0x8   :  { %v840_v8 = vld [vmem:[%s1120_s1 + $0x20] sm:$0xff]  ;;  %v839_v9 = vld [vmem:[%s1120_s1 + $0x18] sm:$0xff]  ;;  %v309_v11 = vld [vmem:[%s1121_s2 + $0x68] sm:$0xff] }
   0x9   :  { %v308_v10 = vld [vmem:[%s1121_s2 + $0x60] sm:$0xff]  ;;  %v298_v12 = vld [vmem:[%s1121_s2 + $0x10] sm:$0xff]  ;;  %v837_v14 = vld [vmem:[%s1120_s1 + $0x8] sm:$0xff] }
   0xa   :  { %198 = vmatpush.bf16.msra.mxu0 %v841_v5  ;;  %870 = vmatpush.bf16.msra.mxu3 %v841_v5  ;;  %v838_v13 = vld [vmem:[%s1120_s1 + $0x10] sm:$0xff]  ;;  %v301_v15 = vld [vmem:[%s1121_s2 + $0x28] sm:$0xff]  ;;  %v299_v16 = vld [vmem:[%s1121_s2 + $0x18] sm:$0xff] }
   0xb   :  { %319 = vperm.xlu0 %888, %v297_v6   ;;  %324 = vperm.xlu2 %890, %v298_v12   ;;  %v310_v17 = vld [vmem:[%s1121_s2 + $0x70] sm:$0xff]  ;;  %v836_v18 = vld [vmem:[%s1120_s1] sm:$0xff]  ;;  %v849_v20 = vld [vmem:[%s1119_s0 + $0x28] sm:$0xff] }
   0xc   :  { %369 = vperm.xlu1 %889, %v307_v7   ;;  %v844_v19 = vld [vmem:[%s1119_s0] sm:$0xff]  ;;  %v302_v21 = vld [vmem:[%s1121_s2 + $0x30] sm:$0xff]  ;;  %v303_v22 = vld [vmem:[%s1121_s2 + $0x38] sm:$0xff] }
   0xd   :  { %v300_v23 = vld [vmem:[%s1121_s2 + $0x20] sm:$0xff]  ;;  %v305_v24 = vld [vmem:[%s1121_s2 + $0x48] sm:$0xff]  ;;  %v311_v25 = vld [vmem:[%s1121_s2 + $0x78] sm:$0xff] }
   0xe   :  { %199 = vmatpush.bf16.msra.mxu0 %v840_v8  ;;  %871 = vmatpush.bf16.msra.mxu3 %v840_v8  ;;  %v845_v26 = vld [vmem:[%s1119_s0 + $0x8] sm:$0xff]  ;;  %v850_v27 = vld [vmem:[%s1119_s0 + $0x30] sm:$0xff]  ;;  %v304_v28 = vld [vmem:[%s1121_s2 + $0x40] sm:$0xff] }
   0xf   :  { %v846_v29 = vld [vmem:[%s1119_s0 + $0x10] sm:$0xff]  ;;  %v851_v30 = vld [vmem:[%s1119_s0 + $0x38] sm:$0xff]  ;;  %v848_v32 = vld [vmem:[%s1119_s0 + $0x20] sm:$0xff] }
  0x10   :  { %v847_v31 = vld [vmem:[%s1119_s0 + $0x18] sm:$0xff]  ;;  %v858_v34 = vld [vmem:[%s1122_s3 + $0x30] sm:$0xff]  ;;  %v857_v35 = vld [vmem:[%s1122_s3 + $0x28] sm:$0xff]  ;;  %s919_s0 = smov [#allocation3]  }
  0x11   :  { %v859_v33 = vld [vmem:[%s1122_s3 + $0x38] sm:$0xff]  ;;  %v856_v36 = vld [vmem:[%s1122_s3 + $0x20] sm:$0xff]  ;;  %v854_v38 = vld [vmem:[%s1122_s3 + $0x10] sm:$0xff]  ;;  %s692_s23 = sshll.u32 %s919_s0, 4  ;;  %s693_s23 = int_to_ptr.vmem [resolvable:$true] %s692_s23 }
  0x12   :  { %200 = vmatpush.bf16.msra.mxu0 %v839_v9  ;;  %872 = vmatpush.bf16.msra.mxu3 %v839_v9  ;;  %v855_v37 = vld [vmem:[%s1122_s3 + $0x18] sm:$0xff]  ;;  %v853_v39 = vld [vmem:[%s1122_s3 + $0x8] sm:$0xff]  ;;  %v852_v40 = vld [vmem:[%s1122_s3] sm:$0xff] }
  0x13   :  { %374 = vperm.xlu0 %888, %v308_v10   ;;  %329 = vperm.xlu2 %890, %v299_v16   ;;  %v867_v43 = vld [vmem:[%s1124_s5 + $0x38] sm:$0xff]  ;;  %v866_v46 = vld [vmem:[%s1124_s5 + $0x30] sm:$0xff]  ;;  %v865_v58 = vld [vmem:[%s1124_s5 + $0x28] sm:$0xff] }
  0x14   :  { %379 = vperm.xlu1 %889, %v309_v11   ;;  %540 = vmatpush.bf16.msra.mxu1 %v859_v33  ;;  %v864_v2 = vld [vmem:[%s1124_s5 + $0x20] sm:$0xff]  ;;  %v863_v7 = vld [vmem:[%s1124_s5 + $0x18] sm:$0xff] }
  0x15   :  { %876 = vmatpush.bf16.msra.mxu2 %v859_v33 }
  0x16   :  { %201 = vmatpush.bf16.msra.mxu0 %v838_v13  ;;  %873 = vmatpush.bf16.msra.mxu3 %v838_v13  ;;  %v862_v13 = vld [vmem:[%s1124_s5 + $0x10] sm:$0xff] }
  0x18   :  { %541 = vmatpush.bf16.msra.mxu1 %v858_v34 }
  0x19   :  { %877 = vmatpush.bf16.msra.mxu2 %v858_v34 }
  0x1a   :  { %202 = vmatpush.bf16.msra.mxu0 %v837_v14  ;;  %874 = vmatpush.bf16.msra.mxu3 %v837_v14 }
  0x1b   :  { %339 = vperm.xlu0 %888, %v301_v15   ;;  %334 = vperm.xlu2 %890, %v300_v23  }
  0x1c   :  { %384 = vperm.xlu1 %889, %v310_v17   ;;  %542 = vmatpush.bf16.msra.mxu1 %v857_v35 }
  0x1d   :  { %878 = vmatpush.bf16.msra.mxu2 %v857_v35 }
  0x1e   :  { %203 = vmatpush.bf16.msra.mxu0 %v836_v18  ;;  %875 = vmatpush.bf16.msra.mxu3 %v836_v18 }
  0x20   :  { %543 = vmatpush.bf16.msra.mxu1 %v856_v36 }
  0x21   :  { %204 = vmatmul.bf16.vlgmr.msra.gmra.mxu0 %v844_v19  ;;  %229 = vmatmul.bf16.vlgmr.msra.gmra.mxu3 %v849_v20  ;;  %v861_v20 = vld [vmem:[%s1124_s5 + $0x8] sm:$0xff] }
  0x22   :  { %879 = vmatpush.bf16.msra.mxu2 %v856_v36 }
  0x23   :  { %344 = vperm.xlu0 %888, %v302_v21   ;;  %389 = vperm.xlu2 %890, %v311_v25  }
  0x24   :  { %349 = vperm.xlu1 %889, %v303_v22   ;;  %544 = vmatpush.bf16.msra.mxu1 %v855_v37 }
  0x26   :  { %880 = vmatpush.bf16.msra.mxu2 %v855_v37 }
  0x28   :  { %545 = vmatpush.bf16.msra.mxu1 %v854_v38 }
  0x2a   :  { %881 = vmatpush.bf16.msra.mxu2 %v854_v38 }
  0x2b   :  { %359 = vperm.xlu0 %888, %v305_v24   ;;  %354 = vperm.xlu2 %890, %v304_v28  }
  0x2c   :  { %546 = vmatpush.bf16.msra.mxu1 %v853_v39 }
  0x2e   :  { %882 = vmatpush.bf16.msra.mxu2 %v853_v39 }
  0x30   :  { %547 = vmatpush.bf16.msra.mxu1 %v852_v40 }
  0x31   :  { %209 = vmatmul.bf16.gmra.mxu0 %v845_v26  ;;  %234 = vmatmul.bf16.gmra.mxu3 %v850_v27  ;;  %v860_v26 = vld [vmem:[%s1124_s5] sm:$0xff] }
  0x32   :  { %883 = vmatpush.bf16.msra.mxu2 %v852_v40 }
  0x36   :  { %674 = vmatpush.bf16.msrb.mxu2 %v867_v43 }
  0x3a   :  { %675 = vmatpush.bf16.msrb.mxu2 %v866_v46 }
  0x3e   :  { %676 = vmatpush.bf16.msrb.mxu2 %v865_v58 }
  0x41   :  { %214 = vmatmul.bf16.gmra.mxu0 %v846_v29  ;;  %239 = vmatmul.bf16.gmra.mxu3 %v851_v30 }
  0x42   :  { %677 = vmatpush.bf16.msrb.mxu2 %v864_v2 }
  0x46   :  { %678 = vmatpush.bf16.msrb.mxu2 %v863_v7 }
  0x4a   :  { %679 = vmatpush.bf16.msrb.mxu2 %v862_v13 }
  0x4e   :  { %680 = vmatpush.bf16.msrb.mxu2 %v861_v20 }
  0x51   :  { %219 = vmatmul.bf16.gmra.mxu0 %v847_v31 }
  0x52   :  { %681 = vmatpush.bf16.msrb.mxu2 %v860_v26 }
  0x61   :  { %224 = vmatmul.bf16.gmra.mxu0 %v848_v32 }
  0x65   :  { %v325_v54 = vpop.permute.xlu2 %324 }
  0x6d   :  { %v330_v8 = vpop.permute.xlu2 %329 }
  0x75   :  { %v315_v41 = vpop.permute.xlu0 %314  ;;  %v335_v29 = vpop.permute.xlu2 %334 }
  0x76   :  { %v365_v44 = vpop.permute.xlu1 %364 }
  0x7d   :  { %v320_v48 = vpop.permute.xlu0 %319 }
  0x7e   :  { %v370_v59 = vpop.permute.xlu1 %369 }
  0x85   :  { %v375_v12 = vpop.permute.xlu0 %374 }
  0x86   :  { %v380_v18 = vpop.permute.xlu1 %379 }
  0x8d   :  { %v340_v33 = vpop.permute.xlu0 %339 }
  0x8e   :  { %v385_v37 = vpop.permute.xlu1 %384 }
  0x9e   :  { %v205_v42 = vpop.f32.mrf.mxu0 }
  0x9f   :  { %v392_v45 = vmul.f32 %v315_v41, %v205_v42  ;;  %v390_v42 = vpop.permute.xlu2 %389 }
  0xa1   :  { %v408_v50 = vpack.c.bf16 %v392_v45, %v392_v45 }
  0xa3   :  { %v460_v55 = vunpack.c.l.b16 %v408_v50 }
  0xa4   :  { %v230_v47 = vpop.f32.mrf.mxu3 }
  0xa5   :  { %v402_v51 = vmul.f32 %v365_v44, %v230_v47 }
  0xa6   :  { %v207_v49 = vpop.f32.mrf.mxu0 }
  0xa7   :  { %v393_v52 = vmul.f32 %v320_v48, %v207_v49  ;;  %v418_v56 = vpack.c.bf16 %v402_v51, %v402_v51  ;;  %v345_v51 = vpop.permute.xlu0 %344 }
  0xa9   :  { %v409_v53 = vpack.c.bf16 %v393_v52, %v393_v52  ;;  %v470_v0 = vunpack.c.l.b16 %v418_v56 }
  0xab   :  { %v461_v57 = vunpack.c.l.b16 %v409_v53 }
  0xac   :  { %v232_v60 = vpop.f32.mrf.mxu3 }
  0xad   :  { %v403_v61 = vmul.f32 %v370_v59, %v232_v60  ;;  %v476_v62 = vpack.c.b16 %v461_v57, %v460_v55 }
  0xae   :  { %v210_v63 = vpop.f32.mrf.mxu0 }
  0xaf   :  { %v419_v1 = vpack.c.bf16 %v403_v61, %v403_v61  ;;  %548 = vmatmul.bf16.vlgmr.msra.gmra.mxu1 %v476_v62  ;;  %v394_v4 = vmul.f32 %v325_v54, %v210_v63  ;;  %v350_v54 = vpop.permute.xlu1 %349  ;;  %v355_v63 = vpop.permute.xlu2 %354 }
  0xb1   :  { %v471_v3 = vunpack.c.l.b16 %v419_v1  ;;  %v1097_v10 = vpack.c.bf16 %v394_v4, %v394_v4  ;;  %v360_v1 = vpop.permute.xlu0 %359 }
  0xb3   :  { %v481_v5 = vpack.c.b16 %v471_v3, %v470_v0  ;;  %v462_v16 = vunpack.c.l.b16 %v1097_v10 }
  0xb4   :  { %v235_v6 = vpop.f32.mrf.mxu3 }
  0xb5   :  { %573 = vmatmul.bf16.vlgmr.msra.gmra.mxu2 %v481_v5  ;;  %v404_v14 = vmul.f32 %v375_v12, %v235_v6 }
  0xb6   :  { %v212_v9 = vpop.f32.mrf.mxu0 }
  0xb7   :  { %v395_v11 = vmul.f32 %v330_v8, %v212_v9  ;;  %v420_v21 = vpack.c.bf16 %v404_v14, %v404_v14  ;;  %v891_v9 = vld [vmem:[%s1123_s4] ss:$0 sm:$0xff] }
  0xb9   :  { %v411_v15 = vpack.c.bf16 %v395_v11, %v395_v11  ;;  %v472_v27 = vunpack.c.l.b16 %v420_v21 }
  0xbb   :  { %v463_v17 = vunpack.c.l.b16 %v411_v15 }
  0xbc   :  { %v237_v19 = vpop.f32.mrf.mxu3 }
  0xbd   :  { %v405_v22 = vmul.f32 %v380_v18, %v237_v19  ;;  %v477_v23 = vpack.c.b16 %v463_v17, %v462_v16 }
  0xbe   :  { %v215_v24 = vpop.f32.mrf.mxu0 }
  0xbf   :  { %v421_v25 = vpack.c.bf16 %v405_v22, %v405_v22  ;;  %553 = vmatmul.bf16.gmra.mxu1 %v477_v23  ;;  %v396_v30 = vmul.f32 %v335_v29, %v215_v24 }
  0xc1   :  { %v473_v28 = vunpack.c.l.b16 %v421_v25  ;;  %v412_v35 = vpack.c.bf16 %v396_v30, %v396_v30 }
  0xc3   :  { %v482_v31 = vpack.c.b16 %v473_v28, %v472_v27  ;;  %v464_v40 = vunpack.c.l.b16 %v412_v35 }
  0xc4   :  { %v240_v32 = vpop.f32.mrf.mxu3 }
  0xc5   :  { %578 = vmatmul.bf16.gmra.mxu2 %v482_v31  ;;  %v406_v38 = vmul.f32 %v385_v37, %v240_v32 }
  0xc6   :  { %v217_v34 = vpop.f32.mrf.mxu0 }
  0xc7   :  { %v397_v36 = vmul.f32 %v340_v33, %v217_v34  ;;  %v422_v44 = vpack.c.bf16 %v406_v38, %v406_v38  ;;  %v625_v38 = vld [vmem:[%s1125_s6] sm:$0x1]  ;;  %s920_s6 = smov 128  }
  0xc9   :  { %v413_v39 = vpack.c.bf16 %v397_v36, %v397_v36  ;;  %v474_v49 = vunpack.c.l.b16 %v422_v44 }
  0xcb   :  { %v465_v41 = vunpack.c.l.b16 %v413_v39 }
  0xcc   :  { %v242_v43 = vpop.f32.mrf.mxu3 }
  0xcd   :  { %v407_v45 = vmul.f32 %v390_v42, %v242_v43  ;;  %v478_v46 = vpack.c.b16 %v465_v41, %v464_v40 }
  0xce   :  { %v220_v47 = vpop.f32.mrf.mxu0 }
  0xcf   :  { %v423_v48 = vpack.c.bf16 %v407_v45, %v407_v45  ;;  %558 = vmatmul.bf16.gmra.mxu1 %v478_v46  ;;  %v398_v52 = vmul.f32 %v345_v51, %v220_v47 }
  0xd1   :  { %v475_v50 = vunpack.c.l.b16 %v423_v48  ;;  %v414_v56 = vpack.c.bf16 %v398_v52, %v398_v52 }
  0xd3   :  { %v483_v53 = vpack.c.b16 %v475_v50, %v474_v49  ;;  %v466_v59 = vunpack.c.l.b16 %v414_v56 }
  0xd5   :  { %583 = vmatmul.bf16.gmra.mxu2 %v483_v53 }
  0xd6   :  { %v222_v55 = vpop.f32.mrf.mxu0 }
  0xd7   :  { %v399_v57 = vmul.f32 %v350_v54, %v222_v55 }
  0xd9   :  { %v415_v58 = vpack.c.bf16 %v399_v57, %v399_v57 }
  0xdb   :  { %v467_v60 = vunpack.c.l.b16 %v415_v58 }
  0xdd   :  { %v479_v61 = vpack.c.b16 %v467_v60, %v466_v59 }
  0xde   :  { %v225_v62 = vpop.f32.mrf.mxu0 }
  0xdf   :  { %563 = vmatmul.bf16.gmra.mxu1 %v479_v61  ;;  %v400_v0 = vmul.f32 %v355_v63, %v225_v62 }
  0xe1   :  { %v416_v3 = vpack.c.bf16 %v400_v0, %v400_v0 }
  0xe3   :  { %v468_v6 = vunpack.c.l.b16 %v416_v3 }
  0xe5   :  { %682 = vmatmul.bf16.vlgmr.msrb.gmra.mxu2 %v1097_v10 }
  0xe6   :  { %v227_v2 = vpop.f32.mrf.mxu0 }
  0xe7   :  { %v401_v4 = vmul.f32 %v360_v1, %v227_v2 }
  0xe9   :  { %v417_v5 = vpack.c.bf16 %v401_v4, %v401_v4 }
  0xeb   :  { %v469_v7 = vunpack.c.l.b16 %v417_v5 }
  0xed   :  { %v480_v8 = vpack.c.b16 %v469_v7, %v468_v6 }
  0xef   :  { %568 = vmatmul.bf16.gmra.mxu1 %v480_v8 }
 0x12c   :  { %v549_v11 = vpop.f32.mrf.mxu1 }
 0x12d   :  { %v550_v12 = vadd.f32 %v891_v9, %v549_v11 }
 0x12f   :  { %589 = vst [vmem:[#allocation3] sm:$0xff] %v550_v12 }
 0x134   :  { %v551_v13 = vpop.f32.mrf.mxu1 }
 0x135   :  { %v552_v14 = vadd.f32 %v891_v9, %v551_v13 }
 0x137   :  { %590 = vst [vmem:[#allocation3 + $0x8] sm:$0xff] %v552_v14 }
 0x138   :  { %v574_v10 = vpop.f32.mrf.mxu2 }
 0x139   :  { %v575_v15 = vadd.f32 %v891_v9, %v574_v10 }
 0x13b   :  { %599 = vst [vmem:[#allocation3 + $0x50] sm:$0xff] %v575_v15 }
 0x13c   :  { %v554_v16 = vpop.f32.mrf.mxu1 }
 0x13d   :  { %v555_v17 = vadd.f32 %v891_v9, %v554_v16 }
 0x13f   :  { %591 = vst [vmem:[#allocation3 + $0x10] sm:$0xff] %v555_v17 }
 0x140   :  { %v576_v18 = vpop.f32.mrf.mxu2 }
 0x141   :  { %v577_v19 = vadd.f32 %v891_v9, %v576_v18 }
 0x143   :  { %600 = vst [vmem:[#allocation3 + $0x58] sm:$0xff] %v577_v19 }
 0x144   :  { %v556_v20 = vpop.f32.mrf.mxu1 }
 0x145   :  { %v557_v21 = vadd.f32 %v891_v9, %v556_v20 }
 0x147   :  { %592 = vst [vmem:[#allocation3 + $0x18] sm:$0xff] %v557_v21 }
 0x148   :  { %v579_v22 = vpop.f32.mrf.mxu2 }
 0x149   :  { %v580_v23 = vadd.f32 %v891_v9, %v579_v22 }
 0x14b   :  { %601 = vst [vmem:[#allocation3 + $0x60] sm:$0xff] %v580_v23 }
 0x14c   :  { %v559_v24 = vpop.f32.mrf.mxu1 }
 0x14d   :  { %v560_v25 = vadd.f32 %v891_v9, %v559_v24 }
 0x14f   :  { %593 = vst [vmem:[#allocation3 + $0x20] sm:$0xff] %v560_v25 }
 0x150   :  { %v581_v26 = vpop.f32.mrf.mxu2 }
 0x151   :  { %v582_v27 = vadd.f32 %v891_v9, %v581_v26 }
 0x153   :  { %602 = vst [vmem:[#allocation3 + $0x68] sm:$0xff] %v582_v27 }
 0x154   :  { %v561_v28 = vpop.f32.mrf.mxu1 }
 0x155   :  { %v562_v29 = vadd.f32 %v891_v9, %v561_v28 }
 0x157   :  { %594 = vst [vmem:[#allocation3 + $0x28] sm:$0xff] %v562_v29 }
 0x158   :  { %v584_v30 = vpop.f32.mrf.mxu2 }
 0x159   :  { %v585_v31 = vadd.f32 %v891_v9, %v584_v30 }
 0x15b   :  { %603 = vst [vmem:[#allocation3 + $0x70] sm:$0xff] %v585_v31 }
 0x15c   :  { %v564_v32 = vpop.f32.mrf.mxu1 }
 0x15d   :  { %v565_v33 = vadd.f32 %v891_v9, %v564_v32 }
 0x15f   :  { %595 = vst [vmem:[#allocation3 + $0x30] sm:$0xff] %v565_v33 }
 0x160   :  { %v586_v34 = vpop.f32.mrf.mxu2 }
 0x161   :  { %v587_v35 = vadd.f32 %v891_v9, %v586_v34 }
 0x163   :  { %604 = vst [vmem:[#allocation3 + $0x78] sm:$0xff] %v587_v35 }
 0x164   :  { %v566_v36 = vpop.f32.mrf.mxu1 }
 0x165   :  { %v567_v37 = vadd.f32 %v891_v9, %v566_v36 }
 0x167   :  { %596 = vst [vmem:[#allocation3 + $0x38] sm:$0xff] %v567_v37 }
 0x168   :  { %v683_v39 = vpop.f32.mrf.mxu2 }
 0x169   :  { %v684_v40 = vadd.f32 %v683_v39, %v625_v38 }
 0x16b   :  { %687 = vst [vmem:[#allocation3 + $0x10] sm:$0x1] %v684_v40 }
 0x16c   :  { %v569_v41 = vpop.f32.mrf.mxu1 }
 0x16d   :  { %v570_v42 = vadd.f32 %v891_v9, %v569_v41 }
 0x16f   :  { %597 = vst [vmem:[#allocation3 + $0x40] sm:$0xff] %v570_v42 }
 0x170   :  { %v685_v43 = vpop.f32.mrf.mxu2 }
 0x174   :  { %v571_v44 = vpop.f32.mrf.mxu1 }
 0x175   :  { %v572_v45 = vadd.f32 %v891_v9, %v571_v44 }
 0x177   :  { %598 = vst [vmem:[#allocation3 + $0x48] sm:$0xff] %v572_v45 }
 0x178   :  { %700 = dma.vmem_to_hbm [thread:$0]  %s693_s23, 2048, %s695_s26, [#allocation4], %s920_s6, %s920_s6, %s921_s27  }
 0x179   :  { %916 = dma.done.wait [#allocation4], 2048  }
 0x17a   :  { %917 = vsyncadd [#allocation4], 4294965248 }
 0x17b   :  { %705 = vsyncpa [#allocation4], 1 }

</bundles_post_ra>
